<compile_context>
chip_gen: v7x
topology: tpu7x:2x2x1
jax: 0.10.0
libtpu: 0.0.40
codegen_flags: <defaults>
</compile_context>

<pallas_src>
import jax
import jax.numpy as jnp
from jax import lax
from jax.experimental import pallas as pl
from jax.experimental.pallas import tpu as pltpu


def _sigmoid(x):
    return 1.0 / (1.0 + jnp.exp(-x))


def _fc_sigmoid_softmax_kernel(x_ref, w_ref, b_ref, o_ref):
    # x_ref: (TB, K) VMEM, w_ref: (2, K) VMEM (resident), b_ref: (2,) SMEM,
    # o_ref: (2, TB) VMEM (class-major, batch lane-dense).
    #
    # z[c, b] = sum_k w[c, k] * x[b, k]   (MXU, f32 accumulation)
    z = lax.dot_general(
        w_ref[...],
        x_ref[...],
        dimension_numbers=(((1,), (1,)), ((), ())),
        preferred_element_type=jnp.float32,
    )
    s0 = _sigmoid(z[0:1, :] + b_ref[0])          # sigmoid(logit class 0)
    s1 = _sigmoid(z[1:2, :] + b_ref[1])          # sigmoid(logit class 1)
    # 2-class softmax over (s0, s1): p0 = e^s0/(e^s0+e^s1) = sigmoid(s0 - s1)
    p0 = _sigmoid(s0 - s1)
    o_ref[0:1, :] = p0.astype(o_ref.dtype)
    o_ref[1:2, :] = (1.0 - p0).astype(o_ref.dtype)


def _round_up(n, m):
    return ((n + m - 1) // m) * m


def small_classification_nn_2(x, weight, bias, *, max_rows=8192,
                              target_tile_bytes=8 * 1024 * 1024):
    """x: (B, input_size) f32; weight: (2, input_size) f32 (PyTorch layout);
    bias: (2,) f32.  Returns (B, 2) f32 softmax(sigmoid(linear(x))) probs."""
    B, K = x.shape
    assert weight.shape == (2, K)
    assert bias.shape == (2,)

    # Rows per tile: biggest multiple of 128 that keeps a double-buffered
    # (TB, K) f32 tile well under the explicit 32 MiB VMEM budget, capped to
    # amortize per-grid-step overhead, and never larger than the padded batch.
    rows_by_vmem = max(128, (target_tile_bytes // (K * 4)) // 128 * 128)
    TB = int(min(max_rows, rows_by_vmem, _round_up(B, 128)))
    B_pad = _round_up(B, TB)
    if B_pad != B:
        x = jnp.pad(x, ((0, B_pad - B), (0, 0)))

    out_cm = pl.pallas_call(
        _fc_sigmoid_softmax_kernel,
        out_shape=jax.ShapeDtypeStruct((2, B_pad), jnp.float32),
        grid_spec=pl.GridSpec(
            grid=(B_pad // TB,),
            in_specs=[
                pl.BlockSpec((TB, K), lambda i: (i, 0)),      # streamed x tile
                pl.BlockSpec((2, K), lambda i: (0, 0)),       # resident weight
                pl.BlockSpec(memory_space=pltpu.MemorySpace.SMEM),  # bias
            ],
            out_specs=pl.BlockSpec((2, TB), lambda i: (0, i)),
        ),
        compiler_params=pltpu.CompilerParams(
            dimension_semantics=("parallel",),
            vmem_limit_bytes=32 * 1024 * 1024,
        ),
    )(x, weight, bias)

    # Back to PyTorch orientation (B, 2); drop padded rows.
    return out_cm[:, :B].T


def _reference(x, weight, bias):
    z = x @ weight.T + bias
    s = jax.nn.sigmoid(z)
    return jax.nn.softmax(s, axis=1)


if __name__ == "__main__":
    key = jax.random.PRNGKey(0)
    k_x, k_w, k_b, k_x2 = jax.random.split(key, 4)

    batch = 2
    input_size = 32

    # Deterministic parameter init mirroring the PyTorch module:
    #   weight: xavier_uniform_ on shape (2, input_size)
    #   bias:   nn.Linear default uniform(-1/sqrt(fan_in), 1/sqrt(fan_in))
    fan_in, fan_out = input_size, 2
    xavier_bound = (6.0 / (fan_in + fan_out)) ** 0.5
    weight = jax.random.uniform(
        k_w, (2, input_size), jnp.float32, -xavier_bound, xavier_bound
    )
    bias_bound = 1.0 / (fan_in ** 0.5)
    bias = jax.random.uniform(k_b, (2,), jnp.float32, -bias_bound, bias_bound)

    # Test 1: demo shape (batch=2).
    x = jax.random.normal(k_x, (batch, input_size), jnp.float32)
    out = small_classification_nn_2(x, weight, bias)
    out = jax.block_until_ready(out)
    ref = _reference(x, weight, bias)
    assert out.shape == (batch, 2)
    assert jnp.allclose(out, ref, atol=1e-5, rtol=1e-5)
    assert jnp.allclose(jnp.sum(out, axis=1), jnp.ones((batch,)), atol=1e-5)

    # Test 2: exercise multi-step grid + batch padding (3 grid steps of 128).
    batch2 = 300
    x2 = jax.random.normal(k_x2, (batch2, input_size), jnp.float32)
    out2 = small_classification_nn_2(x2, weight, bias, max_rows=128)
    out2 = jax.block_until_ready(out2)
    ref2 = _reference(x2, weight, bias)
    assert out2.shape == (batch2, 2)
    assert jnp.allclose(out2, ref2, atol=1e-5, rtol=1e-5)

    print("KERNEL_OK")
</pallas_src>

<mosaic_0001>
module attributes {stable_mosaic.version = 11 : i64} {
  func.func @_fc_sigmoid_softmax_kernel(%arg0: i32, %arg1: memref<128x32xf32, #tpu.memory_space<vmem>>, %arg2: memref<2x32xf32, #tpu.memory_space<vmem>>, %arg3: memref<2xf32, #tpu.memory_space<smem>>, %arg4: memref<2x128xf32, #tpu.memory_space<vmem>>) attributes {dimension_semantics = [#tpu.dimension_semantics<parallel>], iteration_bounds = array<i64: 1>, scalar_prefetch = 0 : i64, scratch_operands = 0 : i64, tpu.core_type = #tpu.core_type<tc>, window_params = [{transform_indices = @transform_0, window_bounds = array<i64: 128, 32>}, {pipeline_mode = #tpu.pipeline_mode<synchronous>, transform_indices = @transform_1, window_bounds = array<i64: 2, 32>}, {transform_indices = @transform_2, window_bounds = array<i64: 2>}, {transform_indices = @transform_3, window_bounds = array<i64: 2, 128>}]} {
    %c0 = arith.constant 0 : index
    %c0_0 = arith.constant 0 : index
    %0 = vector.load %arg2[%c0, %c0_0] : memref<2x32xf32, #tpu.memory_space<vmem>>, vector<2x32xf32>
    %c0_1 = arith.constant 0 : index
    %c0_2 = arith.constant 0 : index
    %1 = vector.load %arg1[%c0_1, %c0_2] : memref<128x32xf32, #tpu.memory_space<vmem>>, vector<128x32xf32>
    %cst = arith.constant dense<0.000000e+00> : vector<2x128xf32>
    %2 = tpu.matmul %0, %1, %cst {dimension_numbers = #tpu.dot_dimension_numbers<[1], [1], [0], [0], [0, 0, 1, 0], [], []>} : vector<2x32xf32>, vector<128x32xf32>, vector<2x128xf32> -> vector<2x128xf32>
    %3 = vector.extract_strided_slice %2 {offsets = [0, 0], sizes = [1, 128], strides = [1, 1]} : vector<2x128xf32> to vector<1x128xf32>
    %c0_3 = arith.constant 0 : index
    %4 = memref.load %arg3[%c0_3] : memref<2xf32, #tpu.memory_space<smem>>
    %5 = vector.broadcast %4 : f32 to vector<1x128xf32>
    %6 = arith.addf %3, %5 : vector<1x128xf32>
    %cst_4 = arith.constant 0.000000e+00 : f32
    %7 = vector.broadcast %cst_4 : f32 to vector<1x128xf32>
    %8 = arith.subf %7, %6 : vector<1x128xf32>
    %9 = math.exp %8 : vector<1x128xf32>
    %cst_5 = arith.constant 1.000000e+00 : f32
    %10 = vector.broadcast %cst_5 : f32 to vector<1x128xf32>
    %11 = arith.addf %10, %9 : vector<1x128xf32>
    %cst_6 = arith.constant 1.000000e+00 : f32
    %12 = vector.broadcast %cst_6 : f32 to vector<1x128xf32>
    %13 = arith.divf %12, %11 : vector<1x128xf32>
    %14 = vector.extract_strided_slice %2 {offsets = [1, 0], sizes = [1, 128], strides = [1, 1]} : vector<2x128xf32> to vector<1x128xf32>
    %c1 = arith.constant 1 : index
    %15 = memref.load %arg3[%c1] : memref<2xf32, #tpu.memory_space<smem>>
    %16 = vector.broadcast %15 : f32 to vector<1x128xf32>
    %17 = arith.addf %14, %16 : vector<1x128xf32>
    %cst_7 = arith.constant 0.000000e+00 : f32
    %18 = vector.broadcast %cst_7 : f32 to vector<1x128xf32>
    %19 = arith.subf %18, %17 : vector<1x128xf32>
    %20 = math.exp %19 : vector<1x128xf32>
    %cst_8 = arith.constant 1.000000e+00 : f32
    %21 = vector.broadcast %cst_8 : f32 to vector<1x128xf32>
    %22 = arith.addf %21, %20 : vector<1x128xf32>
    %cst_9 = arith.constant 1.000000e+00 : f32
    %23 = vector.broadcast %cst_9 : f32 to vector<1x128xf32>
    %24 = arith.divf %23, %22 : vector<1x128xf32>
    %25 = arith.subf %13, %24 : vector<1x128xf32>
    %cst_10 = arith.constant 0.000000e+00 : f32
    %26 = vector.broadcast %cst_10 : f32 to vector<1x128xf32>
    %27 = arith.subf %26, %25 : vector<1x128xf32>
    %28 = math.exp %27 : vector<1x128xf32>
    %cst_11 = arith.constant 1.000000e+00 : f32
    %29 = vector.broadcast %cst_11 : f32 to vector<1x128xf32>
    %30 = arith.addf %29, %28 : vector<1x128xf32>
    %cst_12 = arith.constant 1.000000e+00 : f32
    %31 = vector.broadcast %cst_12 : f32 to vector<1x128xf32>
    %32 = arith.divf %31, %30 : vector<1x128xf32>
    %c0_13 = arith.constant 0 : index
    %c0_14 = arith.constant 0 : index
    %33 = vector.load %arg4[%c0_13, %c0_14] : memref<2x128xf32, #tpu.memory_space<vmem>>, vector<1x128xf32>
    tpu.vector_store %arg4[%c0_13, %c0_14], %32 {strides = array<i32>} : memref<2x128xf32, #tpu.memory_space<vmem>>, vector<1x128xf32>,
    %cst_15 = arith.constant 1.000000e+00 : f32
    %34 = vector.broadcast %cst_15 : f32 to vector<1x128xf32>
    %35 = arith.subf %34, %32 : vector<1x128xf32>
    %c1_16 = arith.constant 1 : index
    %c0_17 = arith.constant 0 : index
    %36 = vector.load %arg4[%c1_16, %c0_17] : memref<2x128xf32, #tpu.memory_space<vmem>>, vector<1x128xf32>
    tpu.vector_store %arg4[%c1_16, %c0_17], %35 {strides = array<i32>} : memref<2x128xf32, #tpu.memory_space<vmem>>, vector<1x128xf32>,
    return
  }
  func.func @transform_0(%arg0: i32) -> (i32, i32) {
    %c0_i32 = arith.constant 0 : i32
    %c0_i32_0 = arith.constant 0 : i32
    return %arg0, %c0_i32 : i32, i32
  }
  func.func @transform_1(%arg0: i32) -> (i32, i32) {
    %c0_i32 = arith.constant 0 : i32
    %c0_i32_0 = arith.constant 0 : i32
    %c0_i32_1 = arith.constant 0 : i32
    return %c0_i32, %c0_i32_0 : i32, i32
  }
  func.func @transform_2(%arg0: i32) -> i32 {
    %c0_i32 = arith.constant 0 : i32
    %c0_i32_0 = arith.constant 0 : i32
    return %c0_i32 : i32
  }
  func.func @transform_3(%arg0: i32) -> (i32, i32) {
    %c0_i32 = arith.constant 0 : i32
    %c0_i32_0 = arith.constant 0 : i32
    return %c0_i32, %arg0 : i32, i32
  }
}

</mosaic_0001>

<bundles_post_ra>
// kernel: tpu_custom_call.1
= control target key start
LH: loop header
LB: loop body
LE: loop exit
PB: predicated region body
PF: predicated region fallthrough
CT: control target
= control target key end

     0   :  { %8 = vsyncpa [#allocation4], 0  ;;  %s484_s0 = inlined_call_operand.vmem [shape: f32[128,32], index: 0, kind: input, shape index: {}]   ;;  %s485_s1 = inlined_call_operand.vmem [shape: f32[2,32], index: 1, kind: input, shape index: {}]   ;;  %s486_s2 = inlined_call_operand.vmem [shape: f32[2], index: 2, kind: input, shape index: {}]   ;;  %s487_s3 = inlined_call_operand.hbm [shape: f32[2,128], index: 3, kind: output, shape index: {}]  }
   0x1   :  { %9 = vsyncpa [#allocation3], 0  ;;  %s20_s14 = sshll.u32 %s486_s2, 4  ;;  %s21_s14 = int_to_ptr.vmem [resolvable:$true] %s20_s14 }
   0x2   :  { %s332_s15 = scalar_lea.vmem %s21_s14, 16  ;;  %p337_p1 = scmp.lt.s32.totalorder %s21_s14, %s21_s14 }
   0x3   :  { %p333_p0 = scmp.ne.s32.totalorder %s21_s14, %s332_s15  ;;  %p338_p2 = scmp.lt.s32.totalorder %s332_s15, %s332_s15 }
   0x5   :  { %p339_p3 = por %p338_p2, %p337_p1 }
   0x7   :  { %p340_p4 = pnand %p339_p3, %p333_p0 }
   0x9   :  { %343 = shalt.err (!%p340_p4)
}
   0xa   :  { %s370_s16 = smov [#allocation2]  }
   0xb   :  { %23 = dma.vmem_to_smem %s21_s14, 16, %s370_s16, [#allocation4]  }
   0xc   :  { %366 = dma.done.wait [#allocation4], 16  }
   0xd   :  { %367 = vsyncadd [#allocation4], 4294967280 }
   0xe   :  { %27 = sfence }
   0xf   :  { %v29_v0 = vld [vmem:[%s484_s0] sm:$0xff]  ;;  %v30_v1 = vld [vmem:[%s484_s0 + $0x8] sm:$0xff]  ;;  %vm45_vm0 = vcmask 261120   ;;  %v371_v2 = vmov 0.0|0.0   ;;  %vm372_vm2 = vmmov 0   ;;  %v373_v5 = vmov 0.0  }
  0x10   :  { %283 = vmatprep.subr.bf16.mxu0 %v371_v2  ;;  %v284_v3 = vpack.c.bf16 %v30_v1, %v29_v0  ;;  %vm406_vm1 = vmpackc.low %vm45_vm0, %vm45_vm0  ;;  %280 = vmatprep.mubr.msk.f32.mxu0 %vm372_vm2, %v373_v5  ;;  %v31_v6 = vld [vmem:[%s484_s0 + $0x10] sm:$0xff]  ;;  %v32_v7 = vld [vmem:[%s484_s0 + $0x18] sm:$0xff]  ;;  %s167_s22 = sld [smem:[#allocation2]]  ;;  %s230_s23 = sld [smem:[#allocation2 + $0x1]] }
  0x11   :  { %v288_v8 = vpack.c.bf16 %v32_v7, %v31_v6  ;;  %v33_v9 = vld [vmem:[%s484_s0 + $0x20] sm:$0xff]  ;;  %v34_v10 = vld [vmem:[%s484_s0 + $0x28] sm:$0xff]  ;;  %v35_v12 = vld [vmem:[%s484_s0 + $0x30] sm:$0xff] }
  0x12   :  { %286 = vmatpush3.bf16.xpose.msk.msra.mxu0 %vm406_vm1, %v284_v3  ;;  %v292_v11 = vpack.c.bf16 %v34_v10, %v33_v9  ;;  %v36_v13 = vld [vmem:[%s484_s0 + $0x38] sm:$0xff]  ;;  %v37_v15 = vld [vmem:[%s484_s0 + $0x40] sm:$0xff]  ;;  %v38_v16 = vld [vmem:[%s484_s0 + $0x48] sm:$0xff] }
  0x13   :  { %287 = vmatprep.subr.bf16.mxu0 %v371_v2  ;;  %v296_v14 = vpack.c.bf16 %v36_v13, %v35_v12  ;;  %v300_v17 = vpack.c.bf16 %v38_v16, %v37_v15  ;;  %v39_v18 = vld [vmem:[%s484_s0 + $0x50] sm:$0xff]  ;;  %v40_v19 = vld [vmem:[%s484_s0 + $0x58] sm:$0xff]  ;;  %v41_v21 = vld [vmem:[%s484_s0 + $0x60] sm:$0xff] }
  0x14   :  { %v304_v20 = vpack.c.bf16 %v40_v19, %v39_v18  ;;  %v42_v22 = vld [vmem:[%s484_s0 + $0x68] sm:$0xff]  ;;  %v43_v24 = vld [vmem:[%s484_s0 + $0x70] sm:$0xff]  ;;  %v44_v25 = vld [vmem:[%s484_s0 + $0x78] sm:$0xff]  ;;  %s374_s0 = smov [#allocation5]  }
  0x15   :  { %v308_v23 = vpack.c.bf16 %v42_v22, %v41_v21  ;;  %v312_v26 = vpack.c.bf16 %v44_v25, %v43_v24  ;;  %v28_v27 = vld [vmem:[%s485_s1] sm:$0x3]  ;;  %s204_s1 = sshll.u32 %s374_s0, 4  ;;  %s205_s1 = int_to_ptr.vmem [resolvable:$true] %s204_s1 }
  0x16   :  { %v168_v28 = vstv %s167_s22  ;;  %v177_v29 = vstv %s230_s23  ;;  %s344_s24 = scalar_lea.vmem %s205_s1, 32  ;;  %p349_p6 = scmp.lt.s32.totalorder %s205_s1, %s205_s1 }
  0x17   :  { %p345_p5 = scmp.ne.s32.totalorder %s205_s1, %s344_s24  ;;  %p350_p7 = scmp.lt.s32.totalorder %s344_s24, %s344_s24 }
  0x19   :  { %p351_p8 = por %p350_p7, %p349_p6 }
  0x1a   :  { %290 = vmatpush3.bf16.xpose.msk.msra.mxu0 %vm406_vm1, %v288_v8 }
  0x1b   :  { %291 = vmatprep.subr.bf16.mxu0 %v371_v2  ;;  %p352_p9 = pnand %p351_p8, %p345_p5 }
  0x22   :  { %294 = vmatpush3.bf16.xpose.msk.msra.mxu0 %vm406_vm1, %v292_v11 }
  0x23   :  { %295 = vmatprep.subr.bf16.mxu0 %v371_v2 }
  0x2a   :  { %298 = vmatpush3.bf16.xpose.msk.msra.mxu0 %vm406_vm1, %v296_v14 }
  0x2b   :  { %299 = vmatprep.subr.bf16.mxu0 %v371_v2 }
  0x32   :  { %302 = vmatpush3.bf16.xpose.msk.msra.mxu0 %vm406_vm1, %v300_v17 }
  0x33   :  { %303 = vmatprep.subr.bf16.mxu0 %v371_v2 }
  0x3a   :  { %306 = vmatpush3.bf16.xpose.msk.msra.mxu0 %vm406_vm1, %v304_v20 }
  0x3b   :  { %307 = vmatprep.subr.bf16.mxu0 %v371_v2 }
  0x42   :  { %310 = vmatpush3.bf16.xpose.msk.msra.mxu0 %vm406_vm1, %v308_v23 }
  0x43   :  { %311 = vmatprep.subr.bf16.mxu0 %v371_v2 }
  0x4a   :  { %314 = vmatpush3.bf16.xpose.msk.msra.mxu0 %vm406_vm1, %v312_v26 }
  0x51   :  { %281 = vmatmul.mubr.msk.f32.vlgmr.msra.gmra.mrb[0].mxu0 %vm45_vm0, %v28_v27 }
 0x124   :  { %v163_v30 = vpop.f32.mrb[0].mxu0 }
 0x125   :  { %v169_v31 = vadd.f32 %v168_v28, %v163_v30  ;;  %v178_v32 = vadd.f32 %v177_v29, %v163_v30  ;;  %v282_v33 = vpop.f32.mrb[1].mxu0 }
 0x127   :  { %v170_v34 = vsub.f32 0.0, %v169_v31  ;;  %v179_v35 = vsub.f32 0.0, %v178_v32 }
 0x129   :  { %v171_v36 = vmul.f32 1.442695, %v170_v34  ;;  %v180_v37 = vmul.f32 1.442695, %v179_v35 }
 0x12b   :  { %320 = vpow2.f32 %v171_v36 }
 0x12c   :  { %322 = vpow2.f32 %v180_v37 }
 0x135   :  { %v321_v38 = vpop.eup %320 }
 0x136   :  { %v323_v39 = vpop.eup %322  ;;  %v173_v40 = vadd.f32 1.0, %v321_v38 }
 0x137   :  { %v182_v41 = vadd.f32 1.0, %v323_v39 }
 0x139   :  { %324 = vrcp.f32 %v182_v41 }
 0x13a   :  { %326 = vrcp.f32 %v173_v40 }
 0x143   :  { %v325_v42 = vpop.eup %324 }
 0x144   :  { %v186_v43 = vrot.slane %v325_v42, 1  ;;  %v327_v44 = vpop.eup %326 }
 0x146   :  { %v188_v45 = vsub.f32 %v327_v44, %v186_v43 }
 0x148   :  { %v189_v46 = vsub.f32 0.0, %v188_v45 }
 0x14a   :  { %v190_v47 = vmul.f32 1.442695, %v189_v46 }
 0x14c   :  { %328 = vpow2.f32 %v190_v47 }
 0x156   :  { %v329_v48 = vpop.eup %328 }
 0x157   :  { %v192_v49 = vadd.f32 1.0, %v329_v48 }
 0x159   :  { %330 = vrcp.f32 %v192_v49 }
 0x163   :  { %v331_v50 = vpop.eup %330 }
 0x164   :  { %195 = vst [vmem:[#allocation5] sm:$0x1] %v331_v50  ;;  %v196_v51 = vsub.f32 1.0, %v331_v50 }
 0x166   :  { %197 = vst [vmem:[#allocation5 + $0x1] sm:$0x1] %v196_v51 }
 0x167   :  { %355 = shalt.err (!%p352_p9)
}
 0x168   :  { %s356_s27 = scalar_lea.hbm %s487_s3, 32 }
 0x169   :  { %p357_p10 = scmp.ne.s32.totalorder %s487_s3, %s356_s27  ;;  %p360_p11 = scmp.lt.u32.totalorder %s356_s27, %s487_s3 }
 0x16b   :  { %p362_p12 = pnand %p360_p11, %p357_p10 }
 0x16d   :  { %365 = shalt.err (!%p362_p12)
}
 0x16e   :  { %207 = dma.vmem_to_hbm [thread:$0]  %s205_s1, 32, %s487_s3, [#allocation3]  }
 0x16f   :  { %368 = dma.done.wait [#allocation3], 32  }
 0x170   :  { %369 = vsyncadd [#allocation3], 4294967264 }
 0x171   :  { %211 = vsyncpa [#allocation3], 1 }
 0x172   :  { %212 = vsyncpa [#allocation4], 1 }

</bundles_post_ra>
